<compile_context>
chip_gen: v6e
topology: v6e:2x2x1
jax: 0.10.0
libtpu: 0.0.40
codegen_flags: <defaults>
</compile_context>

<pallas_src>
import functools

import jax
import jax.numpy as jnp
from jax.experimental import pallas as pl
from jax.experimental.pallas import tpu as pltpu


def _round_up(x, m):
    return ((x + m - 1) // m) * m


# ----------------------------------------------------------------------------
# Pallas kernel 1: tiled dense layer  out = act(x @ W + b)
# ----------------------------------------------------------------------------
def _matmul_bias_kernel(x_ref, w_ref, b_ref, o_ref, acc_ref, *, activation):
    @pl.when(pl.program_id(2) == 0)
    def _init():
        acc_ref[...] = jnp.zeros_like(acc_ref)

    acc_ref[...] += jnp.dot(x_ref[...], w_ref[...],
                            preferred_element_type=jnp.float32)

    @pl.when(pl.program_id(2) == pl.num_programs(2) - 1)
    def _finalize():
        res = acc_ref[...] + b_ref[...]
        if activation == "tanh":          # fused epilogue (saves one VPU pass)
            res = jnp.tanh(res)
        o_ref[...] = res.astype(o_ref.dtype)


def matmul_bias(x, w, b, *, operand_dtype=jnp.bfloat16, activation=None,
                tm=256, tn=512, tk=512):
    """x:(M,K) f32 @ w:(K,F) f32 + b:(F,) -> (M,F) f32, MXU-tiled & pipelined.

    Operands are cast to `operand_dtype` (default bf16), accumulation is f32.
    Tile sizes are clipped/aligned to the data; inputs are zero-padded to tile
    multiples (exact for a matmul) and the result is sliced back.
    """
    M, K = x.shape
    K2, F = w.shape
    assert K == K2 and b.shape == (F,)

    itemsize = jnp.dtype(operand_dtype).itemsize
    sub_align = 8 * (4 // itemsize)                 # 8 for f32, 16 for bf16
    tm = min(tm, _round_up(M, sub_align))
    tn = min(tn, _round_up(F, 128))
    tk = min(tk, _round_up(K, 128))
    Mp, Kp, Fp = _round_up(M, tm), _round_up(K, tk), _round_up(F, tn)

    xp = jnp.pad(x, ((0, Mp - M), (0, Kp - K))).astype(operand_dtype)
    wp = jnp.pad(w, ((0, Kp - K), (0, Fp - F))).astype(operand_dtype)
    bp = jnp.pad(b, (0, Fp - F)).reshape(1, Fp).astype(jnp.float32)

    kernel = functools.partial(_matmul_bias_kernel, activation=activation)
    out = pl.pallas_call(
        kernel,
        out_shape=jax.ShapeDtypeStruct((Mp, Fp), jnp.float32),
        grid=(Mp // tm, Fp // tn, Kp // tk),
        in_specs=[
            pl.BlockSpec((tm, tk), lambda i, j, k: (i, k)),
            pl.BlockSpec((tk, tn), lambda i, j, k: (k, j)),
            pl.BlockSpec((1, tn), lambda i, j, k: (0, j)),
        ],
        out_specs=pl.BlockSpec((tm, tn), lambda i, j, k: (i, j)),
        scratch_shapes=[pltpu.VMEM((tm, tn), jnp.float32)],
        compiler_params=pltpu.CompilerParams(
            dimension_semantics=("parallel", "parallel", "arbitrary"),
            vmem_limit_bytes=48 * 1024 * 1024),
        cost_estimate=pl.CostEstimate(
            flops=2 * Mp * Kp * Fp,
            transcendentals=Mp * Fp if activation == "tanh" else 0,
            bytes_accessed=(Mp * Kp + Kp * Fp) * itemsize + Fp * 4 + Mp * Fp * 4),
    )(xp, wp, bp)
    return out[:M, :F]


# ----------------------------------------------------------------------------
# Pallas kernel 2: token-tiled distillation losses with fused teacher
#                  vocab projection.
#   loss_ce : KLDivLoss(batchmean)(log_softmax(s/T), softmax(t/T)) * T^2,
#             restricted to rows where labels > -1  (restrict_ce_to_mask)
#   loss_mlm: CrossEntropyLoss(ignore_index=-100)(s_logits, labels)
#   loss_cos: CosineEmbeddingLoss(target=1) on attention-masked hidden rows
# torch.masked_select (dynamic shape) is replaced by mask-weighted reductions.
# ----------------------------------------------------------------------------
def _distill_loss_kernel(s_logits_ref, s_hid_ref, t_hid_ref, wv_ref, bv_ref,
                         labels_ref, attn_ref, out_ref, acc_ref, *,
                         temperature, vocab_size):
    step = pl.program_id(0)

    @pl.when(step == 0)
    def _init():
        for idx in range(6):
            acc_ref[idx] = jnp.float32(0.0)

    s_logits = s_logits_ref[...]                       # (TR, Vp) f32
    labels = labels_ref[...]                           # (TR, 1)  i32
    attn = attn_ref[...]                               # (TR, 1)  i32
    TR, Vp = s_logits.shape

    # Fused teacher vocab projection: teacher logits never touch HBM.
    # TODO(synk): at BERT vocab scale (V~30K, D=768) the full Wv block should
    #             additionally be tiled over V with an online softmax.
    t_logits = (
        jnp.dot(t_hid_ref[...].astype(wv_ref.dtype), wv_ref[...],
                preferred_element_type=jnp.float32)
        + bv_ref[...]
    )                                                   # (TR, Vp) f32

    col = jax.lax.broadcasted_iota(jnp.int32, (TR, Vp), 1)
    valid = col < vocab_size                            # mask pad vocab columns
    neg = jnp.float32(-1e30)
    s_val = jnp.where(valid, s_logits, neg)
    t_val = jnp.where(valid, t_logits, neg)

    inv_t = jnp.float32(1.0 / temperature)
    m_s = jnp.max(s_val, axis=-1, keepdims=True)        # reused for KL and MLM
    m_t = jnp.max(t_val, axis=-1, keepdims=True)

    # Tempered student log-partition (exp pass 1 of 3).
    s_shift = (s_val - m_s) * inv_t
    log_zs = jnp.log(jnp.sum(jnp.exp(s_shift), axis=-1, keepdims=True))

    # Teacher tempered softmax AND log-partition from one exp pass (pass 2).
    t_shift = (t_val - m_t) * inv_t
    e_t = jnp.exp(t_shift)
    z_t = jnp.sum(e_t, axis=-1, keepdims=True)
    t_p = e_t * pl.reciprocal(z_t, approx=True)
    log_zt = jnp.log(z_t)

    # KL(t || s) per row:  sum_j t_p * (t_logp - s_logp)
    #   = sum_j t_p * (t_shift - s_shift) + (log_zs - log_zt)   (sum t_p = 1)
    kl_row = (jnp.sum(t_p * (t_shift - s_shift), axis=-1, keepdims=True)
              + (log_zs - log_zt))

    # MLM cross-entropy per row (exp pass 3, reuses m_s).
    lse = m_s + jnp.log(jnp.sum(jnp.exp(s_val - m_s), axis=-1, keepdims=True))
    safe_lab = jnp.where(labels >= 0, labels, 0)
    picked = jnp.sum(jnp.where(col == safe_lab, s_logits, 0.0),
                     axis=-1, keepdims=True)
    ce_row = lse - picked

    # Cosine-embedding loss per row (target = +1); per-norm eps like torch.
    s_hid = s_hid_ref[...]
    t_hid = t_hid_ref[...]
    dot = jnp.sum(s_hid * t_hid, axis=-1, keepdims=True)
    ns = jnp.maximum(jnp.sqrt(jnp.sum(s_hid * s_hid, axis=-1, keepdims=True)),
                     1e-8)
    nt = jnp.maximum(jnp.sqrt(jnp.sum(t_hid * t_hid, axis=-1, keepdims=True)),
                     1e-8)
    cos_row = 1.0 - dot / (ns * nt)

    lab_mask = (labels > -1).astype(jnp.float32)        # KL + MLM positions
    cos_mask = (attn != 0).astype(jnp.float32)          # attention positions

    acc_ref[0] += jnp.sum(kl_row * lab_mask)
    acc_ref[1] += jnp.sum(lab_mask)
    acc_ref[2] += jnp.sum(ce_row * lab_mask)
    acc_ref[3] += jnp.sum(lab_mask)
    acc_ref[4] += jnp.sum(cos_row * cos_mask)
    acc_ref[5] += jnp.sum(cos_mask)

    @pl.when(step == pl.num_programs(0) - 1)
    def _finalize():
        t2 = jnp.float32(temperature * temperature)
        out_ref[0] = acc_ref[0] / jnp.maximum(acc_ref[1], 1.0) * t2   # loss_ce
        out_ref[1] = acc_ref[2] / jnp.maximum(acc_ref[3], 1.0)        # loss_mlm
        out_ref[2] = acc_ref[4] / jnp.maximum(acc_ref[5], 1.0)        # loss_cos


def distill_losses(s_logits, s_hid, t_hid, wv_t, bv_t, labels, attn, *,
                   temperature, token_tile=256):
    """Returns [loss_ce, loss_mlm, loss_cos] (f32[3])."""
    N, V = s_logits.shape
    D = s_hid.shape[1]

    TR = min(token_tile, _round_up(N, 8))
    Np = _round_up(N, TR)
    Vp = _round_up(V, 128)
    Dp = _round_up(D, 8)

    pad_r = Np - N
    s_logits_p = jnp.pad(s_logits, ((0, pad_r), (0, Vp - V)))
    s_hid_p = jnp.pad(s_hid, ((0, pad_r), (0, Dp - D)))
    t_hid_p = jnp.pad(t_hid, ((0, pad_r), (0, Dp - D)))
    wv_p = jnp.pad(wv_t, ((0, Dp - D), (0, Vp - V))).astype(jnp.bfloat16)
    bv_p = jnp.pad(bv_t, (0, Vp - V)).reshape(1, Vp).astype(jnp.float32)
    labels_p = jnp.pad(labels.reshape(-1, 1).astype(jnp.int32),
                       ((0, pad_r), (0, 0)), constant_values=-100)
    attn_p = jnp.pad(attn.reshape(-1, 1).astype(jnp.int32),
                     ((0, pad_r), (0, 0)), constant_values=0)

    kernel = functools.partial(_distill_loss_kernel,
                               temperature=float(temperature), vocab_size=V)
    return pl.pallas_call(
        kernel,
        out_shape=jax.ShapeDtypeStruct((3,), jnp.float32),
        grid=(Np // TR,),
        in_specs=[
            pl.BlockSpec((TR, Vp), lambda i: (i, 0)),     # student logits
            pl.BlockSpec((TR, Dp), lambda i: (i, 0)),     # student hidden
            pl.BlockSpec((TR, Dp), lambda i: (i, 0)),     # teacher hidden
            pl.BlockSpec((Dp, Vp), lambda i: (0, 0)),     # teacher Wv (resident)
            pl.BlockSpec((1, Vp), lambda i: (0, 0)),      # teacher bv
            pl.BlockSpec((TR, 1), lambda i: (i, 0)),      # labels
            pl.BlockSpec((TR, 1), lambda i: (i, 0)),      # attention mask
        ],
        out_specs=pl.BlockSpec(memory_space=pltpu.SMEM),
        scratch_shapes=[pltpu.SMEM((6,), jnp.float32)],
        compiler_params=pltpu.CompilerParams(
            dimension_semantics=("arbitrary",),
            vmem_limit_bytes=48 * 1024 * 1024),
        cost_estimate=pl.CostEstimate(
            flops=2 * Np * Dp * Vp + 12 * Np * Vp,
            transcendentals=3 * Np * Vp,
            bytes_accessed=(s_logits_p.size * 4 + s_hid_p.size * 4
                            + t_hid_p.size * 4 + wv_p.size * 2 + bv_p.size * 4
                            + labels_p.size * 4 + attn_p.size * 4 + 3 * 4)),
    )(s_logits_p, s_hid_p, t_hid_p, wv_p, bv_p, labels_p, attn_p)


# ----------------------------------------------------------------------------
# Synthetic student / teacher (embedding lookup + Pallas dense layers); shapes
# match a MaskedLM head: hidden (B,S,D), logits (B,S,V).
# ----------------------------------------------------------------------------
def init_model_params(key, vocab_size, dim):
    k1, k2, k3, k4, k5 = jax.random.split(key, 5)
    return {
        "emb": 0.1 * jax.random.normal(k1, (vocab_size, dim), jnp.float32),
        "Wh": 0.1 * jax.random.normal(k2, (dim, dim), jnp.float32),
        "bh": 0.01 * jax.random.normal(k3, (dim,), jnp.float32),
        "Wv": 0.1 * jax.random.normal(k4, (dim, vocab_size), jnp.float32),
        "bv": 0.01 * jax.random.normal(k5, (vocab_size,), jnp.float32),
    }


def model_hidden(params, input_ids):
    """Returns last_hidden (N, D) with N = B*S."""
    flat_ids = input_ids.reshape(-1)
    emb = params["emb"][flat_ids]   # TODO(synk): embedding gather stays in XLA glue
    return matmul_bias(emb, params["Wh"], params["bh"], activation="tanh")


# ----------------------------------------------------------------------------
# DistillationWrapper.forward equivalent.
# ----------------------------------------------------------------------------
def distillation_wrapper_forward(student_params, teacher_params, input_ids,
                                 attention_mask, labels=None, *,
                                 temperature=2.0, alpha_ce=5.0, alpha_mlm=2.0,
                                 alpha_cos=1.0, loss_token_tile=256):
    B, S = input_ids.shape
    s_hid = model_hidden(student_params, input_ids)                    # (N, D)
    s_logits = matmul_bias(s_hid, student_params["Wv"],
                           student_params["bv"])                       # (N, V)
    V = s_logits.shape[-1]
    D = s_hid.shape[-1]

    loss = None
    if labels is not None:
        # teacher under no_grad; its vocab projection is fused into the loss
        # kernel so teacher logits are never materialized in HBM.
        t_hid = jax.lax.stop_gradient(model_hidden(teacher_params, input_ids))
        losses = distill_losses(
            s_logits, s_hid, t_hid,
            jax.lax.stop_gradient(teacher_params["Wv"]),
            jax.lax.stop_gradient(teacher_params["bv"]),
            labels, attention_mask,
            temperature=temperature, token_tile=loss_token_tile)
        loss_ce, loss_mlm, loss_cos = losses[0], losses[1], losses[2]
        loss = alpha_mlm * loss_mlm + alpha_ce * loss_ce
        if alpha_cos > 0.0:
            loss = loss + alpha_cos * loss_cos

    return {
        "loss": loss,
        "logits": s_logits.reshape(B, S, V),
        "hidden_states": (s_hid.reshape(B, S, D),),
        "attentions": None,
    }


# ----------------------------------------------------------------------------
# Pure-JAX reference of the loss math (for a numerics sanity check).
# ----------------------------------------------------------------------------
def reference_losses(s_logits, s_hid, t_hid, wv_t, bv_t, labels, attn, temperature):
    labels = labels.reshape(-1)
    attn = attn.reshape(-1)
    t_logits = jnp.dot(t_hid.astype(jnp.bfloat16), wv_t.astype(jnp.bfloat16),
                       preferred_element_type=jnp.float32) + bv_t
    T = temperature
    lab_mask = (labels > -1).astype(jnp.float32)
    n_lab = jnp.maximum(lab_mask.sum(), 1.0)

    s_lp = jax.nn.log_softmax(s_logits / T, axis=-1)
    t_lp = jax.nn.log_softmax(t_logits / T, axis=-1)
    kl = jnp.sum(jnp.exp(t_lp) * (t_lp - s_lp), axis=-1)
    loss_ce = jnp.sum(kl * lab_mask) / n_lab * (T * T)

    lse = jax.nn.logsumexp(s_logits, axis=-1)
    safe = jnp.where(labels >= 0, labels, 0)
    picked = jnp.take_along_axis(s_logits, safe[:, None], axis=-1)[:, 0]
    loss_mlm = jnp.sum((lse - picked) * lab_mask) / n_lab

    cmask = (attn != 0).astype(jnp.float32)
    n_cos = jnp.maximum(cmask.sum(), 1.0)
    dot = jnp.sum(s_hid * t_hid, axis=-1)
    ns = jnp.maximum(jnp.sqrt(jnp.sum(s_hid * s_hid, axis=-1)), 1e-8)
    nt = jnp.maximum(jnp.sqrt(jnp.sum(t_hid * t_hid, axis=-1)), 1e-8)
    loss_cos = jnp.sum((1.0 - dot / (ns * nt)) * cmask) / n_cos
    return loss_ce, loss_mlm, loss_cos


if __name__ == "__main__":
    B, S, D, V = 2, 8, 32, 128
    key = jax.random.PRNGKey(0)
    k_stu, k_tea, k_ids, k_lab = jax.random.split(key, 4)

    student_params = init_model_params(k_stu, V, D)
    teacher_params = init_model_params(k_tea, V, D)

    input_ids = jax.random.randint(k_ids, (B, S), 0, V, dtype=jnp.int32)
    attention_mask = jnp.ones((B, S), jnp.int32).at[1, 6:].set(0)
    # labels: -100 everywhere except a few masked-LM positions
    rand_labels = jax.random.randint(k_lab, (B, S), 0, V, dtype=jnp.int32)
    mlm_positions = (jnp.zeros((B, S), jnp.bool_)
                     .at[0, 2].set(True).at[0, 5].set(True)
                     .at[1, 1].set(True).at[1, 3].set(True))
    labels = jnp.where(mlm_positions, rand_labels, -100)

    # loss_token_tile=8 -> grid=(2,) so the multi-step SMEM accumulation path
    # is exercised even at this toy size.
    out = distillation_wrapper_forward(
        student_params, teacher_params, input_ids, attention_mask, labels,
        loss_token_tile=8)
    jax.block_until_ready(out["loss"])
    jax.block_until_ready(out["logits"])

    assert out["logits"].shape == (B, S, V)
    assert out["hidden_states"][0].shape == (B, S, D)
    assert bool(jnp.isfinite(out["loss"]))

    # Numerics sanity check against a pure-JAX reference.
    s_logits_flat = out["logits"].reshape(-1, V)
    s_hid_flat = out["hidden_states"][0].reshape(-1, D)
    t_hid_flat = model_hidden(teacher_params, input_ids)
    ref_ce, ref_mlm, ref_cos = reference_losses(
        s_logits_flat, s_hid_flat, t_hid_flat,
        teacher_params["Wv"], teacher_params["bv"],
        labels, attention_mask, 2.0)
    ref_loss = 2.0 * ref_mlm + 5.0 * ref_ce + 1.0 * ref_cos
    assert bool(jnp.allclose(out["loss"], ref_loss, rtol=2e-2, atol=2e-2)), (
        float(out["loss"]), float(ref_loss))

    print("KERNEL_OK")
</pallas_src>

<mosaic_0001>
module attributes {stable_mosaic.version = 11 : i64} {
  func.func @_matmul_bias_kernel(%arg0: i32, %arg1: i32, %arg2: i32, %arg3: memref<16x128xbf16, #tpu.memory_space<vmem>>, %arg4: memref<128x128xbf16, #tpu.memory_space<vmem>>, %arg5: memref<1x128xf32, #tpu.memory_space<vmem>>, %arg6: memref<16x128xf32, #tpu.memory_space<vmem>>, %arg7: memref<16x128xf32, #tpu.memory_space<vmem>>) attributes {dimension_semantics = [#tpu.dimension_semantics<parallel>, #tpu.dimension_semantics<parallel>, #tpu.dimension_semantics<arbitrary>], iteration_bounds = array<i64: 1, 1, 1>, scalar_prefetch = 0 : i64, scratch_operands = 1 : i64, tpu.core_type = #tpu.core_type<tc>, window_params = [{transform_indices = @transform_0, window_bounds = array<i64: 16, 128>}, {transform_indices = @transform_1, window_bounds = array<i64: 128, 128>}, {transform_indices = @transform_2, window_bounds = array<i64: 1, 128>}, {transform_indices = @transform_3, window_bounds = array<i64: 16, 128>}]} {
    %c0_i32 = arith.constant 0 : i32
    %0 = arith.cmpi eq, %arg2, %c0_i32 : i32
    %1 = arith.extui %0 : i1 to i32
    %c0_i32_0 = arith.constant 0 : i32
    %2 = arith.cmpi ne, %1, %c0_i32_0 : i32
    scf.if %2 {
      %cst_10 = arith.constant 0.000000e+00 : f32
      %12 = vector.broadcast %cst_10 : f32 to vector<16x128xf32>
      %c0_11 = arith.constant 0 : index
      %c0_12 = arith.constant 0 : index
      %13 = vector.load %arg7[%c0_11, %c0_12] : memref<16x128xf32, #tpu.memory_space<vmem>>, vector<16x128xf32>
      tpu.vector_store %arg7[%c0_11, %c0_12], %12 {strides = array<i32>} : memref<16x128xf32, #tpu.memory_space<vmem>>, vector<16x128xf32>,
    } else {
    }
    %c0 = arith.constant 0 : index
    %c0_1 = arith.constant 0 : index
    %3 = vector.load %arg7[%c0, %c0_1] : memref<16x128xf32, #tpu.memory_space<vmem>>, vector<16x128xf32>
    %c0_2 = arith.constant 0 : index
    %c0_3 = arith.constant 0 : index
    %4 = vector.load %arg3[%c0_2, %c0_3] : memref<16x128xbf16, #tpu.memory_space<vmem>>, vector<16x128xbf16>
    %c0_4 = arith.constant 0 : index
    %c0_5 = arith.constant 0 : index
    %5 = vector.load %arg4[%c0_4, %c0_5] : memref<128x128xbf16, #tpu.memory_space<vmem>>, vector<128x128xbf16>
    %cst = arith.constant dense<0.000000e+00> : vector<16x128xf32>
    %6 = tpu.matmul %4, %5, %cst {dimension_numbers = #tpu.dot_dimension_numbers<[1], [0], [0], [1], [0, 0, 1, 1], [], []>} : vector<16x128xbf16>, vector<128x128xbf16>, vector<16x128xf32> -> vector<16x128xf32>
    %7 = arith.addf %3, %6 : vector<16x128xf32>
    %c0_6 = arith.constant 0 : index
    %c0_7 = arith.constant 0 : index
    %8 = vector.load %arg7[%c0_6, %c0_7] : memref<16x128xf32, #tpu.memory_space<vmem>>, vector<16x128xf32>
    tpu.vector_store %arg7[%c0_6, %c0_7], %7 {strides = array<i32>} : memref<16x128xf32, #tpu.memory_space<vmem>>, vector<16x128xf32>,
    %c0_i32_8 = arith.constant 0 : i32
    %9 = arith.cmpi eq, %arg2, %c0_i32_8 : i32
    %10 = arith.extui %9 : i1 to i32
    %c0_i32_9 = arith.constant 0 : i32
    %11 = arith.cmpi ne, %10, %c0_i32_9 : i32
    scf.if %11 {
      %c0_10 = arith.constant 0 : index
      %c0_11 = arith.constant 0 : index
      %12 = vector.load %arg7[%c0_10, %c0_11] : memref<16x128xf32, #tpu.memory_space<vmem>>, vector<16x128xf32>
      %c0_12 = arith.constant 0 : index
      %c0_13 = arith.constant 0 : index
      %13 = vector.load %arg5[%c0_12, %c0_13] : memref<1x128xf32, #tpu.memory_space<vmem>>, vector<1x128xf32>
      %14 = vector.broadcast %13 : vector<1x128xf32> to vector<16x128xf32>
      %15 = arith.addf %12, %14 : vector<16x128xf32>
      %16 = math.tanh %15 : vector<16x128xf32>
      %c0_14 = arith.constant 0 : index
      %c0_15 = arith.constant 0 : index
      %17 = vector.load %arg6[%c0_14, %c0_15] : memref<16x128xf32, #tpu.memory_space<vmem>>, vector<16x128xf32>
      tpu.vector_store %arg6[%c0_14, %c0_15], %16 {strides = array<i32>} : memref<16x128xf32, #tpu.memory_space<vmem>>, vector<16x128xf32>,
    } else {
    }
    return
  }
  func.func @transform_0(%arg0: i32, %arg1: i32, %arg2: i32) -> (i32, i32) {
    %c0_i32 = arith.constant 0 : i32
    return %arg0, %arg2 : i32, i32
  }
  func.func @transform_1(%arg0: i32, %arg1: i32, %arg2: i32) -> (i32, i32) {
    %c0_i32 = arith.constant 0 : i32
    return %arg2, %arg1 : i32, i32
  }
  func.func @transform_2(%arg0: i32, %arg1: i32, %arg2: i32) -> (i32, i32) {
    %c0_i32 = arith.constant 0 : i32
    %c0_i32_0 = arith.constant 0 : i32
    return %c0_i32, %arg1 : i32, i32
  }
  func.func @transform_3(%arg0: i32, %arg1: i32, %arg2: i32) -> (i32, i32) {
    %c0_i32 = arith.constant 0 : i32
    return %arg0, %arg1 : i32, i32
  }
}

</mosaic_0001>

<bundles_post_ra>
// kernel: tpu_custom_call.1
= control target key start
LH: loop header
LB: loop body
LE: loop exit
PB: predicated region body
PF: predicated region fallthrough
CT: control target
= control target key end

     0   :  { %8 = vsyncpa [#allocation4], 0  ;;  %s373_s0 = inlined_call_operand.hbm [shape: bf16[16,128], index: 0, kind: input, shape index: {}]   ;;  %s374_s1 = inlined_call_operand.hbm [shape: bf16[128,128], index: 1, kind: input, shape index: {}]   ;;  %s375_s2 = inlined_call_operand.vmem [shape: f32[1,128], index: 2, kind: input, shape index: {}]   ;;  %s376_s3 = inlined_call_operand.hbm [shape: f32[16,128], index: 3, kind: output, shape index: {}]  }
   0x1   :  { %9 = vsyncpa [#allocation7], 0 }
   0x2   :  { %10 = vsyncpa [#allocation5], 0  ;;  %s332_s12 = smov [#allocation3]  }
   0x3   :  { %s16_s13 = sshll.u32 %s332_s12, 4  ;;  %s17_s13 = int_to_ptr.vmem [resolvable:$true] %s16_s13 }
   0x4   :  { %s274_s14 = scalar_lea.vmem %s17_s13, 128  ;;  %p279_p1 = scmp.lt.s32.totalorder %s17_s13, %s17_s13 }
   0x5   :  { %p275_p0 = scmp.ne.s32.totalorder %s17_s13, %s274_s14  ;;  %p280_p2 = scmp.lt.s32.totalorder %s274_s14, %s274_s14 }
   0x7   :  { %p281_p3 = por %p280_p2, %p279_p1 }
   0x9   :  { %p282_p4 = pnand %p281_p3, %p275_p0 }
   0xb   :  { %285 = shalt.err (!%p282_p4)
}
   0xc   :  { %s333_s15 = smov 64   ;;  %s334_s16 = smov 4  }
   0xd   :  { %22 = dma.hbm_to_vmem [thread:$0]  %s373_s0, 128, %s17_s13, [#allocation4], %s333_s15, %s333_s15, %s334_s16  }
   0xe   :  { %s335_s19 = smov [#allocation6]  }
   0xf   :  { %s28_s20 = sshll.u32 %s335_s19, 4  ;;  %s29_s20 = int_to_ptr.vmem [resolvable:$true] %s28_s20 }
  0x10   :  { %s294_s21 = scalar_lea.vmem %s29_s20, 1024  ;;  %p299_p6 = scmp.lt.s32.totalorder %s29_s20, %s29_s20 }
  0x11   :  { %p295_p5 = scmp.ne.s32.totalorder %s29_s20, %s294_s21  ;;  %p300_p7 = scmp.lt.s32.totalorder %s294_s21, %s294_s21 }
  0x13   :  { %p301_p8 = por %p300_p7, %p299_p6 }
  0x15   :  { %p302_p9 = pnand %p301_p8, %p295_p5 }
  0x17   :  { %305 = shalt.err (!%p302_p9)
}
  0x18   :  { %34 = dma.hbm_to_vmem [thread:$0]  %s374_s1, 1024, %s29_s20, [#allocation7], %s333_s15, %s333_s15, %s334_s16  }
  0x19   :  { %326 = dma.done.wait [#allocation4], 128  }
  0x1a   :  { %327 = vsyncadd [#allocation4], 4294967168 }
  0x1b   :  { %328 = dma.done.wait [#allocation7], 1024  }
  0x1c   :  { %329 = vsyncadd [#allocation7], 4294966272  ;;  %v336_v0 = vmov 0.0   ;;  %vm337_vm0 = vmmov 0   ;;  %v253_v1 = vld [vmem:[#allocation6 + $0x38] sm:$0xff]   ;;  %v254_v2 = vld [vmem:[#allocation6 + $0x30] sm:$0xff]  }
  0x1d   :  { %224 = vmatprep.subr.bf16.mxu0 %v336_v0  ;;  %240 = vmatprep.mubr.msk.bf16.mxu0 %vm337_vm0, %v336_v0  ;;  %v255_v3 = vld [vmem:[#allocation6 + $0x28] sm:$0xff]   ;;  %v256_v4 = vld [vmem:[#allocation6 + $0x20] sm:$0xff]   ;;  %v257_v5 = vld [vmem:[#allocation6 + $0x18] sm:$0xff]   ;;  %s338_s24 = smov [#allocation8]  }
  0x1e   :  { %225 = vmatpush3.bf16.msra.mxu0 %v253_v1  ;;  %v258_v6 = vld [vmem:[#allocation6 + $0x10] sm:$0xff]   ;;  %v259_v7 = vld [vmem:[#allocation6 + $0x8] sm:$0xff]   ;;  %v260_v8 = vld [vmem:[#allocation6] sm:$0xff]   ;;  %s192_s25 = sshll.u32 %s338_s24, 4  ;;  %s193_s25 = int_to_ptr.vmem [resolvable:$true] %s192_s25 }
  0x1f   :  { %226 = vmatprep.subr.bf16.mxu0 %v336_v0  ;;  %v261_v9 = vld [vmem:[#allocation3] sm:$0xff]   ;;  %s306_s26 = scalar_lea.vmem %s193_s25, 256  ;;  %p311_p11 = scmp.lt.s32.totalorder %s193_s25, %s193_s25 }
  0x20   :  { %v214_v10 = vld [vmem:[%s375_s2] ss:$0 sm:$0xff]  ;;  %p307_p10 = scmp.ne.s32.totalorder %s193_s25, %s306_s26  ;;  %p312_p12 = scmp.lt.s32.totalorder %s306_s26, %s306_s26 }
  0x22   :  { %227 = vmatpush3.bf16.msra.mxu0 %v254_v2  ;;  %p313_p13 = por %p312_p12, %p311_p11 }
  0x23   :  { %228 = vmatprep.subr.bf16.mxu0 %v336_v0 }
  0x24   :  { %p314_p0 = pnand %p313_p13, %p307_p10 }
  0x26   :  { %229 = vmatpush3.bf16.msra.mxu0 %v255_v3 }
  0x27   :  { %230 = vmatprep.subr.bf16.mxu0 %v336_v0 }
  0x2a   :  { %231 = vmatpush3.bf16.msra.mxu0 %v256_v4 }
  0x2b   :  { %232 = vmatprep.subr.bf16.mxu0 %v336_v0 }
  0x2e   :  { %233 = vmatpush3.bf16.msra.mxu0 %v257_v5 }
  0x2f   :  { %234 = vmatprep.subr.bf16.mxu0 %v336_v0 }
  0x32   :  { %235 = vmatpush3.bf16.msra.mxu0 %v258_v6 }
  0x33   :  { %236 = vmatprep.subr.bf16.mxu0 %v336_v0 }
  0x36   :  { %237 = vmatpush3.bf16.msra.mxu0 %v259_v7 }
  0x37   :  { %238 = vmatprep.subr.bf16.mxu0 %v336_v0 }
  0x3a   :  { %239 = vmatpush3.bf16.msra.mxu0 %v260_v8 }
  0x3d   :  { %241 = vmatmul.mubr.bf16.vlgmr.msra.gmra.mxu0 %v261_v9 }
  0xfd   :  { %v158_v11 = vpop.f32.mrf.mxu0 }
  0xfe   :  { %v181_v12 = vadd.f32 %v214_v10, %v158_v11 }
  0xff   :  { %v242_v13 = vpop.f32.mrf.mxu0 }
 0x100   :  { %262 = vtanh.f32 %v181_v12 }
 0x101   :  { %v161_v14 = vpop.f32.mrf.mxu0 }
 0x102   :  { %v182_v15 = vadd.f32 %v214_v10, %v161_v14 }
 0x103   :  { %v243_v16 = vpop.f32.mrf.mxu0 }
 0x104   :  { %264 = vtanh.f32 %v182_v15 }
 0x10d   :  { %v263_v17 = vpop.eup %262 }
 0x10e   :  { %185 = vst [vmem:[#allocation8] sm:$0xff] %v263_v17 }
 0x111   :  { %v265_v18 = vpop.eup %264 }
 0x112   :  { %186 = vst [vmem:[#allocation8 + $0x8] sm:$0xff] %v265_v18 }
 0x113   :  { %317 = shalt.err (!%p314_p0)
}
 0x114   :  { %s339_s2 = smov 128   ;;  %s340_s27 = smov 8  }
 0x115   :  { %198 = dma.vmem_to_hbm [thread:$0]  %s193_s25, 256, %s376_s3, [#allocation5], %s339_s2, %s339_s2, %s340_s27  }
 0x116   :  { %330 = dma.done.wait [#allocation5], 256  }
 0x117   :  { %331 = vsyncadd [#allocation5], 4294967040 }
 0x118   :  { %202 = vsyncpa [#allocation4], 1 }
 0x119   :  { %203 = vsyncpa [#allocation7], 1 }
 0x11a   :  { %204 = vsyncpa [#allocation5], 1 }

</bundles_post_ra>
